<compile_context>
chip_gen: v5e
topology: v5e:2x2
jax: 0.10.0
libtpu: 0.0.40
codegen_flags: <defaults>
</compile_context>

<pallas_src>
import functools
import math

import jax
import jax.numpy as jnp
import numpy as np
from jax import lax
from jax.experimental import pallas as pl
from jax.experimental.pallas import tpu as pltpu


# --------------------------- packed-weight layout -----------------------------
def _pack_offsets(batch, inplanes, hide, p):
    """Static row offsets of the sub-blocks inside the packed bf16 weight array.
    Row starts are aligned to 16 (one bf16 sublane tile) so in-kernel ref slices stay
    tile-aligned."""
    def up(n):
        return ((n + 15) // 16) * 16
    r_conv = 0
    r_qkv = r_conv + up(2 * batch * hide)
    r_out = r_qkv + up(p)
    r_mask = r_out + up(batch * inplanes)
    n_rows = r_mask + up(batch * hide)
    n_cols = max(batch * 2 * inplanes + 1, 3 * p, batch * hide + 1)
    return r_conv, r_qkv, r_out, r_mask, n_rows, n_cols


# ------------------------------- Pallas kernel ---------------------------------
def prompt_block_kernel(x_ref, w_ref, out_ref, *, batch, inplanes, hide, p):
    """Single gridless invocation.
       x_ref : [B*C, P]          float32   (batch-stacked input slab)
       w_ref : packed weights    bfloat16  (one VMEM block, sliced below)
       out   : [B*inplanes, P]   float32   (reshape-only output layout)"""
    BH = batch * hide              # rows of the batch-stacked hidden slab
    BC = batch * 2 * inplanes      # rows of the batch-stacked input slab
    BO = batch * inplanes          # rows of the batch-stacked output slab
    P = p
    r_conv, r_qkv, r_out, r_mask, _, _ = _pack_offsets(batch, inplanes, hide, p)

    # Static views into the single packed weight block (no extra DMAs).
    w_conv = w_ref[r_conv:r_conv + 2 * BH, 0:BC]          # [2*B*hide, B*C]
    b_conv = w_ref[r_conv:r_conv + 2 * BH, BC:BC + 1]     # [2*B*hide, 1]
    w_qkv = w_ref[r_qkv:r_qkv + P, 0:3 * P]               # [P, 3P]  (q | k | v)
    w_out = w_ref[r_out:r_out + BO, 0:BH]                 # [B*inplanes, B*hide]
    b_out = w_ref[r_out:r_out + BO, BH:BH + 1]            # [B*inplanes, 1]
    a_mask = w_ref[r_mask:r_mask + BH, 0:BH]              # additive attention mask

    # conv0_0 / conv0_1 fused into one block-diagonal matmul over the batch-stacked slab.
    conv = jnp.dot(w_conv, x_ref[...].astype(jnp.bfloat16),
                   preferred_element_type=jnp.float32) + b_conv.astype(jnp.float32)
    x0 = conv[:BH, :]                       # conv0_0(x0)  [B*hide, P] f32 (residual path)
    conv_bf = conv.astype(jnp.bfloat16)     # single cast feeding the fused projection

    # Fused q/k/v projection: Linear over H == right-multiply by kron(I_W, W.T);
    # 1/sqrt(P) already folded into the q block.  One MXU issue for all three.
    proj = jnp.dot(conv_bf, w_qkv, preferred_element_type=jnp.float32)  # [2*BH, 3P] f32
    q = proj[BH:, 0:P]                      # q from the conv0_1(x1) rows
    k = proj[:BH, P:2 * P]                  # k from the conv0_0(x0) rows
    v = proj[:BH, 2 * P:3 * P]              # v from the conv0_0(x0) rows

    # Batched attention: one score matmul for every batch at once; the additive mask
    # (-1e9 on cross-batch blocks) keeps the softmax block-diagonal per batch.
    s = jnp.dot(q, k.T, preferred_element_type=jnp.float32) + a_mask.astype(jnp.float32)
    s = s - jnp.max(s, axis=-1, keepdims=True)
    e = jnp.exp(s)
    attn = e * pl.reciprocal(jnp.sum(e, axis=-1, keepdims=True), approx=True)
    att = jnp.dot(attn, v, preferred_element_type=jnp.float32)          # [B*hide, P]

    # Residual + prompt_enhance (dropout == identity in eval mode).
    x1n = x0 + att
    avg = jnp.mean(x1n, axis=-1, keepdims=True)
    mx = jnp.max(x1n, axis=-1, keepdims=True)
    scale = jax.nn.sigmoid(jnp.maximum(avg, 0.0) + jnp.maximum(mx, 0.0))
    x0n = x0 + x1n * scale                                              # [B*hide, P] f32

    # conv1x1, block-diagonal over the batch: output lands directly in the
    # reshape-only [B*inplanes, P] layout (single store, no scratch round trip).
    out_ref[...] = jnp.dot(w_out, x0n.astype(jnp.bfloat16),
                           preferred_element_type=jnp.float32) + b_out.astype(jnp.float32)


# ------------------------------ param packing ----------------------------------
def prepare_params(params, B, W, H):
    """Fold / pack all module parameters into ONE bf16 block, once per parameter set."""
    hide, inplanes = params["w00"].shape
    C = 2 * inplanes
    P = W * H
    BH, BC, BO = B * hide, B * C, B * inplanes
    f32 = jnp.float32

    # conv0_0 / conv0_1 fused block-diagonal weight acting on the [B*C, P] input slab.
    z = jnp.zeros((hide, inplanes), f32)
    eye_b = jnp.eye(B, dtype=f32)
    conv_top = jnp.kron(eye_b, jnp.concatenate([params["w00"], z], axis=1))  # [BH, BC]
    conv_bot = jnp.kron(eye_b, jnp.concatenate([z, params["w01"]], axis=1))  # [BH, BC]
    b_conv = jnp.concatenate([jnp.tile(params["b00"], B),
                              jnp.tile(params["b01"], B)]).reshape(2 * BH, 1)
    w_conv = jnp.concatenate(
        [jnp.concatenate([conv_top, conv_bot], axis=0), b_conv], axis=1)     # [2BH, BC+1]

    # Linear-over-H projections as right-multiplies on the P (lane) axis: kron(I_W, W.T).
    # Softmax 1/sqrt(P) folded into wq (exact here since sqrt(64) = 8 is a power of two).
    eye_w = jnp.eye(W, dtype=f32)
    wq_k = jnp.kron(eye_w, params["wq"].T) / math.sqrt(float(P))
    wk_k = jnp.kron(eye_w, params["wk"].T)
    wv_k = jnp.kron(eye_w, params["wv"].T)
    w_qkv = jnp.concatenate([wq_k, wk_k, wv_k], axis=1)                      # [P, 3P]

    # conv1x1 block-diagonal weight producing the reshape-only output layout.
    w_out = jnp.concatenate(
        [jnp.kron(eye_b, params["wc"]),
         jnp.tile(params["bc"], B).reshape(BO, 1)], axis=1)                  # [BO, BH+1]

    # Additive attention mask: 0 on same-batch blocks, -1e9 on cross-batch blocks.
    attn_bias = (jnp.kron(eye_b, jnp.ones((hide, hide), f32)) - 1.0) * 1e9   # [BH, BH]

    r_conv, r_qkv, r_out, r_mask, n_rows, n_cols = _pack_offsets(B, inplanes, hide, P)
    w_pack = jnp.zeros((n_rows, n_cols), f32)
    w_pack = w_pack.at[r_conv:r_conv + 2 * BH, 0:BC + 1].set(w_conv)
    w_pack = w_pack.at[r_qkv:r_qkv + P, 0:3 * P].set(w_qkv)
    w_pack = w_pack.at[r_out:r_out + BO, 0:BH + 1].set(w_out)
    w_pack = w_pack.at[r_mask:r_mask + BH, 0:BH].set(attn_bias)
    return {"w_pack": w_pack.astype(jnp.bfloat16), "hide": int(hide)}


# --------------------------------- wrapper --------------------------------------
@functools.partial(jax.jit, static_argnames=("hide",))
def prompt_block_forward(x, w_pack, *, hide):
    """x: [B, C, W, H] float32 (NCHW, like the PyTorch module)."""
    B, C, W, H = x.shape
    inplanes = C // 2
    P = W * H

    x2d = x.reshape(B * C, P)          # contiguous reshape: free, no extra launch
    out = pl.pallas_call(
        functools.partial(prompt_block_kernel, batch=B, inplanes=inplanes,
                          hide=hide, p=P),
        out_shape=jax.ShapeDtypeStruct((B * inplanes, P), jnp.float32),
        in_specs=[pl.BlockSpec(memory_space=pltpu.MemorySpace.VMEM),
                  pl.BlockSpec(memory_space=pltpu.MemorySpace.VMEM)],
        out_specs=pl.BlockSpec(memory_space=pltpu.MemorySpace.VMEM),
    )(x2d, w_pack)
    return out.reshape(B, inplanes, W, H)   # contiguous reshape: no transpose needed


# ----------------------------- pure-JAX reference -------------------------------
def prompt_block_reference(x, params):
    B, C, W, H = x.shape
    inp = C // 2
    x0 = x[:, :inp]
    x1 = x[:, inp:]

    def conv1x1(xx, w, b):
        return jnp.einsum("bcwh,oc->bowh", xx, w) + b[None, :, None, None]

    x0 = conv1x1(x0, params["w00"], params["b00"])
    x1 = conv1x1(x1, params["w01"], params["b01"])

    # pix_module(x0, x1): W != 16 -> proj_*2 branch (Linear over last dim H)
    q = jnp.einsum("bcwh,oh->bcwo", x1, params["wq"]).reshape(B, -1, W * H)
    k = jnp.einsum("bcwh,oh->bcwo", x0, params["wk"]).reshape(B, -1, W * H)
    v = jnp.einsum("bcwh,oh->bcwo", x0, params["wv"]).reshape(B, -1, W * H)
    s = jnp.einsum("bcp,bdp->bcd", q, k) / jnp.sqrt(jnp.float32(W * H))
    a = jax.nn.softmax(s, axis=-1)
    att = jnp.einsum("bcd,bdp->bcp", a, v).reshape(B, -1, W, H)
    x1n = x0 + att

    avg = jnp.mean(x1n, axis=(2, 3), keepdims=True)
    mx = jnp.max(x1n, axis=(2, 3), keepdims=True)
    scale = jax.nn.sigmoid(jax.nn.relu(avg) + jax.nn.relu(mx))
    x0n = x0 + x1n * scale
    return conv1x1(x0n, params["wc"], params["bc"])


# -------------------------------- param init -------------------------------------
def xavier_uniform(key, shape):
    fan_out, fan_in = shape[0], shape[1]
    bound = math.sqrt(6.0 / (fan_in + fan_out))
    return jax.random.uniform(key, shape, jnp.float32, -bound, bound)


def init_params(key, inplanes, hide_channel, in_dim2=8):
    ks = jax.random.split(key, 8)
    return {
        # conv0_0 / conv0_1 : Conv2d(inplanes -> hide_channel, 1x1)  [out, in]
        "w00": xavier_uniform(ks[0], (hide_channel, inplanes)),
        "b00": jnp.zeros((hide_channel,), jnp.float32),
        "w01": xavier_uniform(ks[1], (hide_channel, inplanes)),
        "b01": jnp.zeros((hide_channel,), jnp.float32),
        # pix_module proj_q2 / k2 / v2 : Linear(8, 8, bias=False)     [out, in]
        "wq": xavier_uniform(ks[2], (in_dim2, in_dim2)),
        "wk": xavier_uniform(ks[3], (in_dim2, in_dim2)),
        "wv": xavier_uniform(ks[4], (in_dim2, in_dim2)),
        # conv1x1 : Conv2d(hide_channel -> inplanes, 1x1)
        "wc": xavier_uniform(ks[5], (inplanes, hide_channel)),
        "bc": jnp.zeros((inplanes,), jnp.float32),
    }


# ----------------------------------- main -----------------------------------------
if __name__ == "__main__":
    key = jax.random.PRNGKey(0)
    k_x, k_p = jax.random.split(key)

    B = 2
    inplanes = 4          # channels per half after the split
    hide_channel = 8
    W = H = 8             # H must be 8 for the proj_*2 (in_dim2=8) branch
    C = 2 * inplanes      # full input channel count

    x = jax.random.normal(k_x, (B, C, W, H), jnp.float32)
    params = init_params(k_p, inplanes, hide_channel)

    packed = prepare_params(params, B, W, H)   # hoisted: once per parameter set
    out = jax.block_until_ready(
        prompt_block_forward(x, packed["w_pack"], hide=packed["hide"]))

    ref = jax.block_until_ready(prompt_block_reference(x, params))
    # bf16 MXU operands + approx softmax reciprocal -> 2e-2 tolerance (as validated).
    np.testing.assert_allclose(np.asarray(out), np.asarray(ref), rtol=2e-2, atol=2e-2)

    print("KERNEL_OK")
</pallas_src>

<mosaic_0001>
module attributes {stable_mosaic.version = 11 : i64} {
  func.func @prompt_block_kernel(%arg0: memref<16x64xf32, #tpu.memory_space<vmem>>, %arg1: memref<128x192xbf16, #tpu.memory_space<vmem>>, %arg2: memref<8x64xf32, #tpu.memory_space<vmem>>) attributes {dimension_semantics = [], scalar_prefetch = 0 : i64, scratch_operands = 0 : i64, tpu.core_type = #tpu.core_type<tc>} {
    %c0 = arith.constant 0 : index
    %c0_0 = arith.constant 0 : index
    %0 = vector.load %arg1[%c0, %c0_0] : memref<128x192xbf16, #tpu.memory_space<vmem>>, vector<32x16xbf16>
    %c0_1 = arith.constant 0 : index
    %c16 = arith.constant 16 : index
    %1 = vector.load %arg1[%c0_1, %c16] : memref<128x192xbf16, #tpu.memory_space<vmem>>, vector<32x1xbf16>
    %c32 = arith.constant 32 : index
    %c0_2 = arith.constant 0 : index
    %2 = vector.load %arg1[%c32, %c0_2] : memref<128x192xbf16, #tpu.memory_space<vmem>>, vector<64x192xbf16>
    %c96 = arith.constant 96 : index
    %c0_3 = arith.constant 0 : index
    %3 = vector.load %arg1[%c96, %c0_3] : memref<128x192xbf16, #tpu.memory_space<vmem>>, vector<8x16xbf16>
    %c96_4 = arith.constant 96 : index
    %c16_5 = arith.constant 16 : index
    %4 = vector.load %arg1[%c96_4, %c16_5] : memref<128x192xbf16, #tpu.memory_space<vmem>>, vector<8x1xbf16>
    %c112 = arith.constant 112 : index
    %c0_6 = arith.constant 0 : index
    %5 = vector.load %arg1[%c112, %c0_6] : memref<128x192xbf16, #tpu.memory_space<vmem>>, vector<16x16xbf16>
    %c0_7 = arith.constant 0 : index
    %c0_8 = arith.constant 0 : index
    %6 = vector.load %arg0[%c0_7, %c0_8] : memref<16x64xf32, #tpu.memory_space<vmem>>, vector<16x64xf32>
    %7 = arith.truncf %6 : vector<16x64xf32> to vector<16x64xbf16>
    %cst = arith.constant dense<0.000000e+00> : vector<32x64xf32>
    %8 = tpu.matmul %0, %7, %cst {dimension_numbers = #tpu.dot_dimension_numbers<[1], [0], [0], [1], [0, 0, 1, 1], [], []>} : vector<32x16xbf16>, vector<16x64xbf16>, vector<32x64xf32> -> vector<32x64xf32>
    %9 = arith.extf %1 : vector<32x1xbf16> to vector<32x1xf32>
    %10 = vector.broadcast %9 : vector<32x1xf32> to vector<32x64xf32>
    %11 = arith.addf %8, %10 : vector<32x64xf32>
    %12 = vector.extract_strided_slice %11 {offsets = [0, 0], sizes = [16, 64], strides = [1, 1]} : vector<32x64xf32> to vector<16x64xf32>
    %13 = arith.truncf %11 : vector<32x64xf32> to vector<32x64xbf16>
    %cst_9 = arith.constant dense<0.000000e+00> : vector<32x192xf32>
    %14 = tpu.matmul %13, %2, %cst_9 {dimension_numbers = #tpu.dot_dimension_numbers<[1], [0], [0], [1], [0, 0, 1, 1], [], []>} : vector<32x64xbf16>, vector<64x192xbf16>, vector<32x192xf32> -> vector<32x192xf32>
    %15 = vector.extract_strided_slice %14 {offsets = [16, 0], sizes = [16, 64], strides = [1, 1]} : vector<32x192xf32> to vector<16x64xf32>
    %16 = vector.extract_strided_slice %14 {offsets = [0, 64], sizes = [16, 64], strides = [1, 1]} : vector<32x192xf32> to vector<16x64xf32>
    %17 = vector.extract_strided_slice %14 {offsets = [0, 128], sizes = [16, 64], strides = [1, 1]} : vector<32x192xf32> to vector<16x64xf32>
    %18 = tpu.transpose %16, [1, 0] : vector<16x64xf32> -> vector<64x16xf32>
    %cst_10 = arith.constant dense<0.000000e+00> : vector<16x16xf32>
    %19 = tpu.matmul %15, %18, %cst_10 {dimension_numbers = #tpu.dot_dimension_numbers<[1], [0], [0], [1], [0, 0, 1, 1], [], []>} : vector<16x64xf32>, vector<64x16xf32>, vector<16x16xf32> -> vector<16x16xf32>
    %20 = arith.extf %5 : vector<16x16xbf16> to vector<16x16xf32>
    %21 = arith.addf %19, %20 : vector<16x16xf32>
    %cst_11 = arith.constant dense<0xFF800000> : vector<16xf32>
    %22 = vector.multi_reduction <maximumf>, %21, %cst_11 [1] : vector<16x16xf32> to vector<16xf32>
    %23 = vector.shape_cast %22 : vector<16xf32> to vector<16x1xf32>
    %24 = vector.broadcast %23 : vector<16x1xf32> to vector<16x16xf32>
    %25 = arith.subf %21, %24 : vector<16x16xf32>
    %26 = math.exp %25 : vector<16x16xf32>
    %cst_12 = arith.constant dense<0.000000e+00> : vector<16xf32>
    %27 = vector.multi_reduction <add>, %26, %cst_12 [1] : vector<16x16xf32> to vector<16xf32>
    %28 = vector.shape_cast %27 : vector<16xf32> to vector<16x1xf32>
    %29 = tpu.reciprocal %28 {approx = true} : vector<16x1xf32> -> vector<16x1xf32>
    %30 = vector.broadcast %29 : vector<16x1xf32> to vector<16x16xf32>
    %31 = arith.mulf %26, %30 : vector<16x16xf32>
    %cst_13 = arith.constant dense<0.000000e+00> : vector<16x64xf32>
    %32 = tpu.matmul %31, %17, %cst_13 {dimension_numbers = #tpu.dot_dimension_numbers<[1], [0], [0], [1], [0, 0, 1, 1], [], []>} : vector<16x16xf32>, vector<16x64xf32>, vector<16x64xf32> -> vector<16x64xf32>
    %33 = arith.addf %12, %32 : vector<16x64xf32>
    %cst_14 = arith.constant dense<0.000000e+00> : vector<16xf32>
    %34 = vector.multi_reduction <add>, %33, %cst_14 [1] : vector<16x64xf32> to vector<16xf32>
    %35 = vector.shape_cast %34 : vector<16xf32> to vector<16x1xf32>
    %cst_15 = arith.constant 6.400000e+01 : f32
    %36 = vector.broadcast %cst_15 : f32 to vector<16x1xf32>
    %37 = arith.divf %35, %36 : vector<16x1xf32>
    %cst_16 = arith.constant dense<0xFF800000> : vector<16xf32>
    %38 = vector.multi_reduction <maximumf>, %33, %cst_16 [1] : vector<16x64xf32> to vector<16xf32>
    %39 = vector.shape_cast %38 : vector<16xf32> to vector<16x1xf32>
    %cst_17 = arith.constant 0.000000e+00 : f32
    %40 = vector.broadcast %cst_17 : f32 to vector<16x1xf32>
    %41 = arith.maximumf %37, %40 : vector<16x1xf32>
    %cst_18 = arith.constant 0.000000e+00 : f32
    %42 = vector.broadcast %cst_18 : f32 to vector<16x1xf32>
    %43 = arith.maximumf %39, %42 : vector<16x1xf32>
    %44 = arith.addf %41, %43 : vector<16x1xf32>
    %45 = arith.negf %44 : vector<16x1xf32>
    %46 = math.exp %45 : vector<16x1xf32>
    %cst_19 = arith.constant 1.000000e+00 : f32
    %47 = vector.broadcast %cst_19 : f32 to vector<16x1xf32>
    %48 = arith.addf %47, %46 : vector<16x1xf32>
    %49 = arith.divf %47, %48 : vector<16x1xf32>
    %50 = vector.broadcast %49 : vector<16x1xf32> to vector<16x64xf32>
    %51 = arith.mulf %33, %50 : vector<16x64xf32>
    %52 = arith.addf %12, %51 : vector<16x64xf32>
    %53 = arith.truncf %52 : vector<16x64xf32> to vector<16x64xbf16>
    %cst_20 = arith.constant dense<0.000000e+00> : vector<8x64xf32>
    %54 = tpu.matmul %3, %53, %cst_20 {dimension_numbers = #tpu.dot_dimension_numbers<[1], [0], [0], [1], [0, 0, 1, 1], [], []>} : vector<8x16xbf16>, vector<16x64xbf16>, vector<8x64xf32> -> vector<8x64xf32>
    %55 = arith.extf %4 : vector<8x1xbf16> to vector<8x1xf32>
    %56 = vector.broadcast %55 : vector<8x1xf32> to vector<8x64xf32>
    %57 = arith.addf %54, %56 : vector<8x64xf32>
    %c0_21 = arith.constant 0 : index
    %c0_22 = arith.constant 0 : index
    %58 = vector.load %arg2[%c0_21, %c0_22] : memref<8x64xf32, #tpu.memory_space<vmem>>, vector<8x64xf32>
    tpu.vector_store %arg2[%c0_21, %c0_22], %57 {strides = array<i32>} : memref<8x64xf32, #tpu.memory_space<vmem>>, vector<8x64xf32>,
    return
  }
}

</mosaic_0001>

<bundles_post_ra>
// kernel: prompt_block_forward.1
= control target key start
LH: loop header
LB: loop body
LE: loop exit
PB: predicated region body
PF: predicated region fallthrough
CT: control target
= control target key end

     0   :  { %v464_v3 = vmov 16   ;;  %vm64_vm0 = vcmask 130048   ;;  %vm132_vm1 = vcmask 523264   ;;  %s465_s3 = smov 64   ;;  %s614_s0 = inlined_call_operand.vmem [shape: f32[16,64], index: 0, kind: input, shape index: {}]   ;;  %s615_s1 = inlined_call_operand.vmem [shape: bf16[128,192], index: 1, kind: input, shape index: {}]   ;;  %s616_s2 = inlined_call_operand.vmem [shape: f32[8,64], index: 2, kind: output, shape index: {}]  }
   0x1   :  { %v27_v0 = vld [vmem:[%s614_s0] sm:$0xff]  ;;  %v28_v1 = vld [vmem:[%s614_s0 + $0x8] sm:$0xff]  ;;  %434 = vset.pattern.permute.xlu0 %v464_v3  ;;  %445 = vset.pattern.permute.xlu2 %v464_v3  ;;  %v14_v11 = vld [vmem:[%s615_s1 + $0x10] sm:$0xf] }
   0x2   :  { %v368_v2 = vld [vmem:[%s615_s1] sm:$0xf]  ;;  %v29_v4 = vpack.c.bf16 %v28_v1, %v27_v0  ;;  %v421_v5 = vld [vmem:[%s615_s1 + $0x4] sm:$0xf0]  ;;  %v15_v12 = vld [vmem:[%s615_s1 + $0x18] sm:$0xf]  ;;  %v32_v20 = vunpack.c.l.bf16 %v14_v11 }
   0x3   :  { %v12_v6 = vld [vmem:[%s615_s1] sm:$0xf]  ;;  %v13_v7 = vld [vmem:[%s615_s1 + $0x8] sm:$0xf]  ;;  %v369_v8 = vor.u32 %v421_v5, %v368_v2  ;;  %v402_v13 = vld [vmem:[%s615_s1 + $0x50] sm:$0xf]  ;;  %v33_v21 = vunpack.c.l.bf16 %v15_v12 }
   0x4   :  { %v30_v9 = vunpack.c.l.bf16 %v12_v6  ;;  %v31_v10 = vunpack.c.l.bf16 %v13_v7  ;;  %78 = vmatpush.bf16.msra.mxu0 %v29_v4  ;;  %v430_v14 = vld [vmem:[%s615_s1 + $0x54] sm:$0xf0]  ;;  %v429_v17 = vld [vmem:[%s615_s1 + $0x54] sm:$0xf]  ;;  %v404_v18 = vld [vmem:[%s615_s1 + $0x58] sm:$0xf0] }
   0x5   :  { %v403_v16 = vor.u32 %v430_v14, %v402_v13  ;;  %v407_v19 = vor.u32 %v429_v17, %v404_v18  ;;  %v440_v22 = vpack.i.bf16 %v33_v21, %v32_v20  ;;  %v372_v23 = vld [vmem:[%s615_s1 + $0x10] sm:$0xf]  ;;  %v422_v24 = vld [vmem:[%s615_s1 + $0x14] sm:$0xf0]  ;;  %v394_v26 = vld [vmem:[%s615_s1 + $0x40] sm:$0xf] }
   0x6   :  { %v435_v15 = vpack.i.bf16 %v31_v10, %v30_v9  ;;  %v373_v25 = vor.u32 %v422_v24, %v372_v23  ;;  %v428_v27 = vld [vmem:[%s615_s1 + $0x44] sm:$0xf0]  ;;  %v427_v28 = vld [vmem:[%s615_s1 + $0x44] sm:$0xf]  ;;  %v396_v30 = vld [vmem:[%s615_s1 + $0x48] sm:$0xf0] }
   0x7   :  { %374 = vmatmul.msk.bf16.vlgmr.msra.gmra.mxu0 %vm64_vm0, %v369_v8  ;;  %143 = vmatpush.bf16.msra.mxu1 %v403_v16  ;;  %v395_v29 = vor.u32 %v428_v27, %v394_v26  ;;  %v399_v31 = vor.u32 %v427_v28, %v396_v30  ;;  %v386_v32 = vld [vmem:[%s615_s1 + $0x30] sm:$0xf]  ;;  %v426_v33 = vld [vmem:[%s615_s1 + $0x34] sm:$0xf0]  ;;  %v425_v34 = vld [vmem:[%s615_s1 + $0x34] sm:$0xf] }
   0x8   :  { %436 = vperm.xlu0 %434, %v435_v15   ;;  %162 = vmatpush.bf16.msra.mxu2 %v407_v19  ;;  %v387_v35 = vor.u32 %v426_v33, %v386_v32  ;;  %v388_v36 = vld [vmem:[%s615_s1 + $0x38] sm:$0xf0]  ;;  %v378_v38 = vld [vmem:[%s615_s1 + $0x20] sm:$0xf]  ;;  %v424_v39 = vld [vmem:[%s615_s1 + $0x24] sm:$0xf0] }
   0x9   :  { %v391_v37 = vor.u32 %v425_v34, %v388_v36  ;;  %v423_v40 = vld [vmem:[%s615_s1 + $0x24] sm:$0xf]  ;;  %v379_v41 = vor.u32 %v424_v39, %v378_v38  ;;  %v380_v42 = vld [vmem:[%s615_s1 + $0x28] sm:$0xf0]  ;;  %v25_v6 = vld [vmem:[%s615_s1 + $0x70] sm:$0xf] }
   0xa   :  { %v383_v43 = vor.u32 %v423_v40, %v380_v42  ;;  %v175_v7 = vunpack.c.l.bf16 %v25_v6  ;;  %v26_v10 = vld [vmem:[%s615_s1 + $0x78] sm:$0xf]  ;;  %v466_v40 = vmov 64.0  }
   0xb   :  { %144 = vmatpush.bf16.msra.mxu1 %v395_v29  ;;  %v176_v12 = vunpack.c.l.bf16 %v26_v10 }
   0xc   :  { %163 = vmatpush.bf16.msra.mxu2 %v399_v31 }
   0xf   :  { %145 = vmatpush.bf16.msra.mxu1 %v387_v35 }
  0x10   :  { %441 = vperm.xlu0 %434, %v440_v22   ;;  %164 = vmatpush.bf16.msra.mxu2 %v391_v37 }
  0x13   :  { %146 = vmatpush.bf16.msra.mxu1 %v379_v41 }
  0x14   :  { %165 = vmatpush.bf16.msra.mxu2 %v383_v43 }
  0x17   :  { %375 = vmatmul.msk.bf16.gmra.mxu0 %vm64_vm0, %v373_v25 }
  0x7a   :  { %v437_v45 = vpop.permute.xlu0 %436 }
  0x7b   :  { %v439_v46 = vunpack.i.h.bf16 %v437_v45  ;;  %v438_v47 = vunpack.i.l.bf16 %v437_v45 }
  0x82   :  { %v442_v53 = vpop.permute.xlu0 %441 }
  0x83   :  { %v444_v54 = vunpack.i.h.bf16 %v442_v53  ;;  %v443_v55 = vunpack.i.l.bf16 %v442_v53 }
  0x84   :  { %v80_v44 = vpop.f32.mrf.mxu0 }
  0x85   :  { %v562_v49 = vadd.f32 %v438_v47, %v80_v44 }
  0x8c   :  { %v82_v48 = vpop.f32.mrf.mxu0 }
  0x8d   :  { %v564_v50 = vadd.f32 %v439_v46, %v82_v48 }
  0x8f   :  { %v90_v51 = vpack.c.bf16 %v564_v50, %v562_v49 }
  0x91   :  { %408 = vmatmul.msk.bf16.vlgmr.msra.gmra.mxu1 %vm132_vm1, %v90_v51  ;;  %410 = vmatmul.msk.bf16.vlgmr.msra.gmra.mxu2 %vm132_vm1, %v90_v51 }
  0x94   :  { %v85_v52 = vpop.f32.mrf.mxu0 }
  0x95   :  { %v86_v57 = vadd.f32 %v443_v55, %v85_v52 }
  0x9c   :  { %v87_v56 = vpop.f32.mrf.mxu0 }
  0x9d   :  { %v88_v58 = vadd.f32 %v444_v54, %v87_v56 }
  0x9f   :  { %v91_v59 = vpack.c.bf16 %v88_v58, %v86_v57 }
  0xa1   :  { %409 = vmatmul.msk.bf16.gmra.mxu1 %vm132_vm1, %v91_v59  ;;  %411 = vmatmul.msk.bf16.gmra.mxu2 %vm132_vm1, %v91_v59 }
 0x10e   :  { %v148_v60 = vpop.f32.mrf.mxu1 }
 0x114   :  { %v167_v61 = vpop.f32.mrf.mxu2 }
 0x116   :  { %v150_v62 = vpop.f32.mrf.mxu1 }
 0x117   :  { %181 = vrot.lane.b32.xlu1 %v150_v62, %s465_s3 }
 0x11c   :  { %v169_v63 = vpop.f32.mrf.mxu2 }
 0x11e   :  { %v153_v4 = vpop.f32.mrf.mxu1 }
 0x11f   :  { %179 = vrot.lane.b32.xlu1 %v148_v60, %s465_s3 }
 0x124   :  { %v172_v0 = vpop.f32.mrf.mxu2 }
 0x126   :  { %v155_v5 = vpop.f32.mrf.mxu1 }
 0x12c   :  { %v173_v1 = vpop.f32.mrf.mxu2 }
 0x189   :  { %v182_v2 = vpop.permute.xlu1 %181 }
 0x18a   :  { %412 = vmatpush.xpose.msk.msra.mxu3 %vm132_vm1, %v182_v2 }
 0x191   :  { %v180_v3 = vpop.permute.xlu1 %179 }
 0x192   :  { %413 = vmatpush.xpose.msk.msra.mxu3 %vm132_vm1, %v180_v3  ;;  %v24_v3 = vld [vmem:[%s615_s1 + $0x60] sm:$0xf] }
 0x195   :  { %414 = vmatmul.msk.f32.vlgmr.msra.gmra.mxu3 %vm132_vm1, %v153_v4  ;;  %v339_v4 = vunpack.c.l.bf16 %v24_v3 }
 0x196   :  { %258 = vmatpush.msrb.mxu3 %v169_v63 }
 0x198   :  { %259 = vmatpush.msrb.mxu3 %v167_v61 }
 0x19d   :  { %415 = vmatmul.msk.f32.gmra.mxu3 %vm132_vm1, %v155_v5 }
 0x218   :  { %v210_v8 = vpop.f32.mrf.mxu3 }
 0x219   :  { %v211_v9 = vadd.f32 %v210_v8, %v175_v7 }
 0x21b   :  { %v216_v11 = vsel %vm64_vm0, %v211_v9, -inf }
 0x21c   :  { %217 = vmax.xlane.f32.xlu2 %v216_v11 }
 0x220   :  { %v213_v13 = vpop.f32.mrf.mxu3 }
 0x221   :  { %v214_v14 = vadd.f32 %v213_v13, %v176_v12 }
 0x223   :  { %v219_v15 = vsel %vm64_vm0, %v214_v14, -inf }
 0x224   :  { %220 = vmax.xlane.f32.xlu2 %v219_v15 }
 0x28f   :  { %v218_v16 = vpop.xlane.xlu2 %217 }
 0x290   :  { %v222_v17 = vsub.f32 %v211_v9, %v218_v16 }
 0x292   :  { %v224_v18 = vmul.f32 1.442695, %v222_v17 }
 0x294   :  { %446 = vpow2.f32 %v224_v18 }
 0x297   :  { %v221_v19 = vpop.xlane.xlu2 %220 }
 0x298   :  { %v223_v20 = vsub.f32 %v214_v14, %v221_v19 }
 0x29a   :  { %v447_v21 = vpop.eup %446  ;;  %v226_v22 = vmul.f32 1.442695, %v223_v20 }
 0x29b   :  { %v228_v23 = vsel %vm64_vm0, %v447_v21, 0.0 }
 0x29c   :  { %448 = vpow2.f32 %v226_v22  ;;  %229 = vadd.xlane.f32.xlu0 %v228_v23 }
 0x2a2   :  { %v449_v24 = vpop.eup %448 }
 0x2a3   :  { %v231_v25 = vsel %vm64_vm0, %v449_v24, 0.0 }
 0x2a4   :  { %232 = vadd.xlane.f32.xlu1 %v231_v25 }
 0x30f   :  { %v230_v26 = vpop.xlane.xlu0 %229 }
 0x310   :  { %450 = vrcp.f32 %v230_v26 }
 0x316   :  { %v451_v27 = vpop.eup %450 }
 0x317   :  { %v236_v28 = vmul.f32 %v451_v27, %v447_v21  ;;  %v233_v29 = vpop.xlane.xlu1 %232 }
 0x318   :  { %452 = vrcp.f32 %v233_v29 }
 0x319   :  { %416 = vmatmul.msk.f32.vlgmr.msrb.gmra.mxu3 %vm64_vm0, %v236_v28  ;;  %454 = vrcp.f32 %v466_v40 }
 0x31e   :  { %v453_v30 = vpop.eup %452 }
 0x31f   :  { %v237_v31 = vmul.f32 %v453_v30, %v449_v24  ;;  %v455_v41 = vpop.eup %454 }
 0x320   :  { %v276_v42 = vmul.f32 64.0, %v455_v41  ;;  %vm280_vm2 = vweird.f32 %v455_v41 }
 0x321   :  { %417 = vmatmul.msk.f32.gmra.mxu3 %vm64_vm0, %v237_v31 }
 0x322   :  { %v277_v43 = vsub.f32 1.0, %v276_v42 }
 0x324   :  { %v278_v44 = vmul.f32 %v455_v41, %v277_v43 }
 0x326   :  { %v279_v45 = vadd.f32 %v455_v41, %v278_v44 }
 0x328   :  { %v281_v47 = vsel %vm280_vm2, %v455_v41, %v279_v45 }
 0x39c   :  { %v261_v32 = vpop.f32.mrf.mxu3 }
 0x39d   :  { %v589_v33 = vadd.f32 %v261_v32, %v562_v49 }
 0x39f   :  { %v269_v34 = vsel %vm132_vm1, %v589_v33, 0.0  ;;  %v284_v35 = vsel %vm132_vm1, %v589_v33, -inf }
 0x3a0   :  { %270 = vadd.xlane.f32.xlu2 %v269_v34 }
 0x3a4   :  { %v264_v36 = vpop.f32.mrf.mxu3 }
 0x3a5   :  { %v596_v37 = vadd.f32 %v264_v36, %v564_v50 }
 0x3a7   :  { %v272_v38 = vsel %vm132_vm1, %v596_v37, 0.0  ;;  %v287_v39 = vsel %vm132_vm1, %v596_v37, -inf }
 0x3a8   :  { %285 = vmax.xlane.f32.xlu2 %v284_v35 }
 0x3b0   :  { %273 = vadd.xlane.f32.xlu2 %v272_v38 }
 0x3b8   :  { %288 = vmax.xlane.f32.xlu2 %v287_v39 }
 0x3d0   :  { %342 = vperm.xlu2 %445, %v339_v4  }
 0x413   :  { %v271_v46 = vpop.xlane.xlu2 %270 }
 0x414   :  { %v282_v48 = vmul.f32 %v281_v47, %v271_v46 }
 0x416   :  { %v290_v52 = vmax.f32 %v282_v48, 0.0 }
 0x41b   :  { %v286_v51 = vpop.xlane.xlu2 %285 }
 0x41c   :  { %v292_v53 = vmax.f32 %v286_v51, 0.0 }
 0x41e   :  { %v294_v54 = vadd.f32 %v292_v53, %v290_v52 }
 0x420   :  { %v418_v55 = vmul.f32 -1.442695, %v294_v54 }
 0x422   :  { %456 = vpow2.f32 %v418_v55 }
 0x423   :  { %v274_v56 = vpop.xlane.xlu2 %273 }
 0x424   :  { %v283_v58 = vmul.f32 %v281_v47, %v274_v56 }
 0x426   :  { %v291_v61 = vmax.f32 %v283_v58, 0.0 }
 0x428   :  { %v457_v57 = vpop.eup %456 }
 0x429   :  { %v302_v59 = vadd.f32 1.0, %v457_v57 }
 0x42b   :  { %458 = vrcp.f32 %v302_v59  ;;  %v289_v60 = vpop.xlane.xlu2 %288  ;;  %v315_v11 = vand.u32 2147483648, %v302_v59  ;;  %vm309_vm4 = vweird.f32 %v302_v59  ;;  %v313_v12 = vand.u32 2147483647, %v302_v59 }
 0x42c   :  { %v293_v62 = vmax.f32 %v289_v60, 0.0 }
 0x42d   :  { %v316_v16 = vor.u32 1.1754944e-38, %v315_v11  ;;  %vm314_vm6 = vcmp.eq.f32.partialorder %v313_v12, 8.507059e+37 }
 0x42e   :  { %v295_v63 = vadd.f32 %v293_v62, %v291_v61 }
 0x430   :  { %v419_v0 = vmul.f32 -1.442695, %v295_v63 }
 0x431   :  { %v459_v1 = vpop.eup %458 }
 0x432   :  { %460 = vpow2.f32 %v419_v0  ;;  %v305_v2 = vmul.f32 %v459_v1, %v302_v59  ;;  %vm310_vm3 = vweird.f32 %v459_v1 }
 0x433   :  { %vm311_vm5 = vmor %vm309_vm4, %vm310_vm3  ;;  %v343_v30 = vpop.permute.xlu2 %342 }
 0x434   :  { %v306_v6 = vsub.f32 1.0, %v305_v2 }
 0x436   :  { %v307_v8 = vmul.f32 %v459_v1, %v306_v6 }
 0x438   :  { %v461_v5 = vpop.eup %460  ;;  %v308_v9 = vadd.f32 %v459_v1, %v307_v8 }
 0x439   :  { %v303_v7 = vadd.f32 1.0, %v461_v5 }
 0x43a   :  { %v312_v14 = vsel %vm311_vm5, %v459_v1, %v308_v9 }
 0x43b   :  { %462 = vrcp.f32 %v303_v7  ;;  %v330_v17 = vand.u32 2147483648, %v303_v7  ;;  %v328_v19 = vand.u32 2147483647, %v303_v7  ;;  %v317_v20 = vsel %vm314_vm6, %v316_v16, %v312_v14 }
 0x43c   :  { %vm324_vm8 = vweird.f32 %v303_v7  ;;  %v334_v24 = vmul.f32 %v317_v20, %v589_v33 }
 0x43d   :  { %v331_v22 = vor.u32 1.1754944e-38, %v330_v17  ;;  %vm329_vm10 = vcmp.eq.f32.partialorder %v328_v19, 8.507059e+37 }
 0x43e   :  { %v336_v27 = vadd.f32 %v334_v24, %v562_v49 }
 0x441   :  { %v463_v10 = vpop.eup %462 }
 0x442   :  { %v320_v13 = vmul.f32 %v463_v10, %v303_v7  ;;  %vm325_vm7 = vweird.f32 %v463_v10 }
 0x443   :  { %vm326_vm9 = vmor %vm324_vm8, %vm325_vm7 }
 0x444   :  { %v321_v15 = vsub.f32 1.0, %v320_v13 }
 0x446   :  { %v322_v18 = vmul.f32 %v463_v10, %v321_v15 }
 0x448   :  { %v323_v21 = vadd.f32 %v463_v10, %v322_v18 }
 0x44a   :  { %v327_v23 = vsel %vm326_vm9, %v463_v10, %v323_v21 }
 0x44b   :  { %v332_v25 = vsel %vm329_vm10, %v331_v22, %v327_v23 }
 0x44c   :  { %v335_v26 = vmul.f32 %v332_v25, %v596_v37 }
 0x44e   :  { %v337_v28 = vadd.f32 %v335_v26, %v564_v50 }
 0x450   :  { %v338_v29 = vpack.c.bf16 %v337_v28, %v336_v27 }
 0x452   :  { %355 = vmatpush.bf16.msrb.mxu0 %v338_v29 }
 0x455   :  { %420 = vmatmul.msk.bf16.vlgmr.msrb.gmra.mxu0 %vm64_vm0, %v24_v3 }
 0x4d2   :  { %v357_v31 = vpop.f32.mrf.mxu0 }
 0x4d3   :  { %v358_v32 = vadd.f32 %v357_v31, %v343_v30 }
 0x4d5   :  { %361 = vst.msk [vmem:[%s616_s2] sm:$0xff] %vm132_vm1, %v358_v32 }
 0x4da   :  { %v359_v33 = vpop.f32.mrf.mxu0 }

</bundles_post_ra>
